<compile_context>
chip_gen: v7x
topology: tpu7x:2x2x1
jax: 0.10.0
libtpu: 0.0.40
codegen_flags: <defaults>
</compile_context>

<pallas_src>
import functools

import jax
import jax.numpy as jnp
from jax import lax
from jax.experimental import pallas as pl
from jax.experimental.pallas import tpu as pltpu

_SQRT_HALF = 0.7071067811865476       # 1/sqrt(2)
_SQRT_2_OVER_PI = 0.7978845608028654  # sqrt(2/pi)


def _gelu(h, approx):
    if approx:
        # tanh approximation -> EUP slot (opt-in for compute-bound configs).
        return 0.5 * h * (1.0 + jnp.tanh(
            jnp.float32(_SQRT_2_OVER_PI) * (h + 0.044715 * h * h * h)))
    # Exact erf GELU: bit-matches torch.nn.GELU() default.
    return 0.5 * h * (1.0 + lax.erf(h * jnp.float32(_SQRT_HALF)))


def _mlp_kernel(x_ref, w1_ref, b1_ref, w2_ref, b2_ref, o_ref, *scratch,
                n_hid_chunks, approx_gelu):
    """Fused per-pixel MLP on a channels-on-sublanes / spatial-on-lanes tile.

    x_ref : (Cin, TS)                     input pixels (lanes = spatial)
    w1_ref: (n_chunks, hid_chunk, Cin)    fc1 weight, chunked along hidden dim
    b1_ref: (n_chunks, hid_chunk, 1)      fc1 bias (f32)
    w2_ref: (n_chunks, Cout, hid_chunk)   fc2 weight, chunked along hidden dim
    b2_ref: (Cout, 1)                     fc2 bias (f32)
    o_ref : (Cout, TS)                    output pixels
    scratch (only when n_hid_chunks > 1): (Cout, TS) f32 accumulator.
    """
    x = x_ref[...]  # native dtype straight into the MXU

    if n_hid_chunks == 1:
        # Single shot: no accumulator round-trip.
        h = jnp.dot(w1_ref[0], x, preferred_element_type=jnp.float32)
        h = _gelu(h + b1_ref[0], approx_gelu)
        y = jnp.dot(w2_ref[0], h.astype(w2_ref.dtype),
                    preferred_element_type=jnp.float32)
        o_ref[...] = (y + b2_ref[...]).astype(o_ref.dtype)
    else:
        # Hidden-dim chunked: peak intermediate is (hid_chunk, TS), not
        # (Chid, TS).  Accumulate fc2 partial products in f32 VMEM scratch.
        acc_ref, = scratch
        acc_ref[...] = jnp.zeros_like(acc_ref)

        @pl.loop(0, n_hid_chunks, unroll=n_hid_chunks <= 8)
        def _(c):
            hc = jnp.dot(w1_ref[c], x, preferred_element_type=jnp.float32)
            hc = _gelu(hc + b1_ref[c], approx_gelu)
            acc_ref[...] += jnp.dot(w2_ref[c], hc.astype(w2_ref.dtype),
                                    preferred_element_type=jnp.float32)

        o_ref[...] = (acc_ref[...] + b2_ref[...]).astype(o_ref.dtype)


@functools.partial(
    jax.jit,
    static_argnames=("tile_s", "hid_chunk", "approx_gelu", "compute_dtype"))
def mlp_forward(x_nchw, w1, b1, w2, b2, *, tile_s=None, hid_chunk=None,
                approx_gelu=False, compute_dtype=None):
    """ShiftViT Mlp forward.

    x_nchw: (N, Cin, H, W)   NCHW, same as the PyTorch module.
    w1:     (Chid, Cin)      fc1 Conv2d weight with the trailing (1,1) squeezed.
    b1:     (Chid,)
    w2:     (Cout, Chid)
    b2:     (Cout,)
    Returns (N, Cout, H, W).
    """
    N, Cin, H, W = x_nchw.shape
    Chid = w1.shape[0]
    Cout = w2.shape[0]
    S = H * W

    x_itemsize = jnp.dtype(x_nchw.dtype).itemsize
    w_dtype = compute_dtype if compute_dtype is not None else w1.dtype
    w_itemsize = jnp.dtype(w_dtype).itemsize

    # ---- hidden-dim chunking (keeps the (hid_chunk, tile_s) intermediate small)
    if hid_chunk is None:
        hid_chunk = Chid if Chid <= 1024 else 512
    hid_chunk = min(hid_chunk, Chid)
    n_hid_chunks = pl.cdiv(Chid, hid_chunk)
    Chid_pad = n_hid_chunks * hid_chunk

    # ---- generation-aware VMEM budget -> spatial tile size
    try:
        vmem_cap = pltpu.get_tpu_info().vmem_capacity_bytes
    except Exception:  # pragma: no cover - conservative fallback (v7x-sized)
        vmem_cap = 64 * 1024 * 1024
    vmem_limit = min(int(vmem_cap * 0.8), 110 * 1024 * 1024)

    # Single resident copy of weights/biases (not double-buffered).
    weight_bytes = (w1.size + w2.size) * w_itemsize + (Chid_pad + Cout) * 4
    # TODO(synk): if weight_bytes ever exceeds the VMEM budget (dims >> 3072),
    # the fc weights would need to be streamed per hidden chunk instead.

    # Per-lane-element VMEM cost: x (double-buffered) + out (double-buffered)
    # + f32 hidden-chunk intermediate + f32 accumulator (chunked path only).
    per_lane = (2 * Cin * x_itemsize + 2 * Cout * x_itemsize + hid_chunk * 4
                + (Cout * 4 if n_hid_chunks > 1 else 0))
    budget = vmem_limit - weight_bytes - 2 * 1024 * 1024
    tile_cap = max(128, min(8192, (budget // per_lane) // 128 * 128))

    if tile_s is None:
        # Padding-aware: split S evenly instead of padding to a hard cap.
        n_s_tiles = pl.cdiv(S, tile_cap)
        if N == 1 and n_s_tiles == 1 and S > 128:
            n_s_tiles = 2  # keep both v7x TensorCores busy
        tile_s = pl.cdiv(pl.cdiv(S, n_s_tiles), 128) * 128
    if tile_s >= S:
        tile_s = S  # full-extent block: always legal, zero masking

    n_s_tiles = pl.cdiv(S, tile_s)
    grid = (N, n_s_tiles)

    # ---- host-side operand prep (no padding / copy of x; weights are tiny)
    x3d = x_nchw.reshape(N, Cin, S)          # pure reshape, no transpose

    if Chid_pad != Chid:
        # Zero-padded hidden rows/cols contribute exactly 0 (gelu(0)=0, W2 cols 0).
        w1 = jnp.pad(w1, ((0, Chid_pad - Chid), (0, 0)))
        b1 = jnp.pad(b1, ((0, Chid_pad - Chid),))
        w2 = jnp.pad(w2, ((0, 0), (0, Chid_pad - Chid)))

    w1_3d = w1.reshape(n_hid_chunks, hid_chunk, Cin)
    b1_3d = b1.astype(jnp.float32).reshape(n_hid_chunks, hid_chunk, 1)
    w2_3d = w2.reshape(Cout, n_hid_chunks, hid_chunk).transpose(1, 0, 2)
    b2_col = b2.astype(jnp.float32).reshape(Cout, 1)

    if compute_dtype is not None:
        # Opt-in (accuracy-gated) bf16 operands, f32 accumulation kept.
        x3d = x3d.astype(compute_dtype)
        w1_3d = w1_3d.astype(compute_dtype)
        w2_3d = w2_3d.astype(compute_dtype)

    # ---- cost estimate (advisory)
    flops = 2 * N * S * (Cin * Chid + Chid * Cout)
    bytes_accessed = (
        N * Cin * S * x_itemsize
        + (w1_3d.size + w2_3d.size) * w_itemsize
        + (Chid_pad + Cout) * 4
        + N * Cout * S * x_itemsize)

    scratch_shapes = []
    if n_hid_chunks > 1:
        scratch_shapes.append(pltpu.VMEM((Cout, tile_s), jnp.float32))

    kernel = functools.partial(_mlp_kernel,
                               n_hid_chunks=n_hid_chunks,
                               approx_gelu=approx_gelu)

    out3d = pl.pallas_call(
        kernel,
        out_shape=jax.ShapeDtypeStruct((N, Cout, S), x_nchw.dtype),
        grid_spec=pltpu.PrefetchScalarGridSpec(
            num_scalar_prefetch=0,
            grid=grid,
            in_specs=[
                # Pixels: channels on sublanes, spatial tile on lanes.
                # Ragged last block handled by Pallas masking (no host pad).
                pl.BlockSpec((None, Cin, tile_s), lambda n, s: (n, 0, s)),
                # Weights/biases are grid-invariant: whole-array VMEM operands
                # -> one resident copy, no pipelined double buffer.
                pl.BlockSpec(memory_space=pltpu.MemorySpace.VMEM),
                pl.BlockSpec(memory_space=pltpu.MemorySpace.VMEM),
                pl.BlockSpec(memory_space=pltpu.MemorySpace.VMEM),
                pl.BlockSpec(memory_space=pltpu.MemorySpace.VMEM),
            ],
            out_specs=pl.BlockSpec((None, Cout, tile_s), lambda n, s: (n, 0, s)),
            scratch_shapes=scratch_shapes,
        ),
        compiler_params=pltpu.CompilerParams(
            dimension_semantics=("parallel", "parallel"),
            vmem_limit_bytes=vmem_limit,
        ),
        cost_estimate=pl.CostEstimate(
            flops=flops,
            transcendentals=N * S * Chid,
            bytes_accessed=bytes_accessed,
        ),
    )(x3d, w1_3d, b1_3d, w2_3d, b2_col)

    return out3d.reshape(N, Cout, H, W)


def _reference(x_nchw, w1, b1, w2, b2):
    """Pure-JAX reference of the PyTorch forward (dropout p=0 -> identity)."""
    x = x_nchw.astype(jnp.float32)                                  # (N,C,H,W)
    h = jnp.einsum("nchw,dc->ndhw", x, w1.astype(jnp.float32))
    h = h + b1.astype(jnp.float32)[None, :, None, None]
    h = 0.5 * h * (1.0 + lax.erf(h * jnp.float32(_SQRT_HALF)))
    y = jnp.einsum("ndhw,od->nohw", h, w2.astype(jnp.float32))
    y = y + b2.astype(jnp.float32)[None, :, None, None]
    return y.astype(x_nchw.dtype)


if __name__ == "__main__":
    key = jax.random.PRNGKey(0)
    kx, k1, kb1, k2, kb2 = jax.random.split(key, 5)

    # Small shapes consistent with the module: in_dim=4, hidden_dim=32, out_dim=4.
    N, Cin, H, W = 2, 4, 16, 16
    Chid, Cout = 32, 4

    x = jax.random.normal(kx, (N, Cin, H, W), dtype=jnp.float32)

    # Conv2d 1x1 weights stored as (out_channels, in_channels) — the torch conv
    # weight with its trailing (1, 1) squeezed.
    w1 = jax.random.normal(k1, (Chid, Cin), dtype=jnp.float32) * 0.1
    b1 = jax.random.normal(kb1, (Chid,), dtype=jnp.float32) * 0.1
    w2 = jax.random.normal(k2, (Cout, Chid), dtype=jnp.float32) * 0.1
    b2 = jax.random.normal(kb2, (Cout,), dtype=jnp.float32) * 0.1

    ref = _reference(x, w1, b1, w2, b2)

    # Default path (single hidden chunk, auto tile).
    out = mlp_forward(x, w1, b1, w2, b2)
    jax.block_until_ready(out)
    assert out.shape == (N, Cout, H, W), out.shape
    assert jnp.allclose(out, ref, atol=1e-4, rtol=1e-4), float(
        jnp.max(jnp.abs(out - ref)))

    # Hidden-dim chunked path (exercises the pl.loop accumulator used for the
    # large ShiftViT configs on v7x).
    out_chunked = mlp_forward(x, w1, b1, w2, b2, hid_chunk=16)
    jax.block_until_ready(out_chunked)
    assert jnp.allclose(out_chunked, ref, atol=1e-4, rtol=1e-4), float(
        jnp.max(jnp.abs(out_chunked - ref)))

    print("KERNEL_OK")
</pallas_src>

<mosaic_0001>
module attributes {stable_mosaic.version = 11 : i64} {
  func.func @_mlp_kernel(%arg0: i32, %arg1: i32, %arg2: memref<1x4x256xf32, #tpu.memory_space<vmem>>, %arg3: memref<1x32x4xf32, #tpu.memory_space<vmem>>, %arg4: memref<1x32x1xf32, #tpu.memory_space<vmem>>, %arg5: memref<1x4x32xf32, #tpu.memory_space<vmem>>, %arg6: memref<4x1xf32, #tpu.memory_space<vmem>>, %arg7: memref<1x4x256xf32, #tpu.memory_space<vmem>>) attributes {dimension_semantics = [#tpu.dimension_semantics<parallel>, #tpu.dimension_semantics<parallel>], iteration_bounds = array<i64: 2, 1>, scalar_prefetch = 0 : i64, scratch_operands = 0 : i64, tpu.core_type = #tpu.core_type<tc>, window_params = [{transform_indices = @transform_0, window_bounds = array<i64: 1, 4, 256>}, {pipeline_mode = #tpu.pipeline_mode<synchronous>, transform_indices = @transform_1, window_bounds = array<i64: 1, 32, 4>}, {pipeline_mode = #tpu.pipeline_mode<synchronous>, transform_indices = @transform_2, window_bounds = array<i64: 1, 32, 1>}, {pipeline_mode = #tpu.pipeline_mode<synchronous>, transform_indices = @transform_3, window_bounds = array<i64: 1, 4, 32>}, {pipeline_mode = #tpu.pipeline_mode<synchronous>, transform_indices = @transform_4, window_bounds = array<i64: 4, 1>}, {transform_indices = @transform_5, window_bounds = array<i64: 1, 4, 256>}]} {
    %c0 = arith.constant 0 : index
    %c0_0 = arith.constant 0 : index
    %c0_1 = arith.constant 0 : index
    %0 = vector.load %arg2[%c0, %c0_0, %c0_1] : memref<1x4x256xf32, #tpu.memory_space<vmem>>, vector<1x4x256xf32>
    %1 = vector.shape_cast %0 : vector<1x4x256xf32> to vector<4x256xf32>
    %c0_2 = arith.constant 0 : index
    %c0_3 = arith.constant 0 : index
    %c0_4 = arith.constant 0 : index
    %2 = vector.load %arg3[%c0_2, %c0_3, %c0_4] : memref<1x32x4xf32, #tpu.memory_space<vmem>>, vector<1x32x4xf32>
    %3 = vector.shape_cast %2 : vector<1x32x4xf32> to vector<32x4xf32>
    %cst = arith.constant dense<0.000000e+00> : vector<32x256xf32>
    %4 = tpu.matmul %3, %1, %cst {dimension_numbers = #tpu.dot_dimension_numbers<[1], [0], [0], [1], [0, 0, 1, 1], [], []>} : vector<32x4xf32>, vector<4x256xf32>, vector<32x256xf32> -> vector<32x256xf32>
    %c0_5 = arith.constant 0 : index
    %c0_6 = arith.constant 0 : index
    %c0_7 = arith.constant 0 : index
    %5 = vector.load %arg4[%c0_5, %c0_6, %c0_7] : memref<1x32x1xf32, #tpu.memory_space<vmem>>, vector<1x32x1xf32>
    %6 = vector.shape_cast %5 : vector<1x32x1xf32> to vector<32x1xf32>
    %7 = vector.broadcast %6 : vector<32x1xf32> to vector<32x256xf32>
    %8 = arith.addf %4, %7 : vector<32x256xf32>
    %cst_8 = arith.constant 5.000000e-01 : f32
    %9 = vector.broadcast %cst_8 : f32 to vector<32x256xf32>
    %10 = arith.mulf %9, %8 : vector<32x256xf32>
    %cst_9 = arith.constant 0.707106769 : f32
    %11 = vector.broadcast %cst_9 : f32 to vector<32x256xf32>
    %12 = arith.mulf %8, %11 : vector<32x256xf32>
    %13 = math.erf %12 : vector<32x256xf32>
    %cst_10 = arith.constant 1.000000e+00 : f32
    %14 = vector.broadcast %cst_10 : f32 to vector<32x256xf32>
    %15 = arith.addf %14, %13 : vector<32x256xf32>
    %16 = arith.mulf %10, %15 : vector<32x256xf32>
    %c0_11 = arith.constant 0 : index
    %c0_12 = arith.constant 0 : index
    %c0_13 = arith.constant 0 : index
    %17 = vector.load %arg5[%c0_11, %c0_12, %c0_13] : memref<1x4x32xf32, #tpu.memory_space<vmem>>, vector<1x4x32xf32>
    %18 = vector.shape_cast %17 : vector<1x4x32xf32> to vector<4x32xf32>
    %cst_14 = arith.constant dense<0.000000e+00> : vector<4x256xf32>
    %19 = tpu.matmul %18, %16, %cst_14 {dimension_numbers = #tpu.dot_dimension_numbers<[1], [0], [0], [1], [0, 0, 1, 1], [], []>} : vector<4x32xf32>, vector<32x256xf32>, vector<4x256xf32> -> vector<4x256xf32>
    %c0_15 = arith.constant 0 : index
    %c0_16 = arith.constant 0 : index
    %20 = vector.load %arg6[%c0_15, %c0_16] : memref<4x1xf32, #tpu.memory_space<vmem>>, vector<4x1xf32>
    %21 = vector.broadcast %20 : vector<4x1xf32> to vector<4x256xf32>
    %22 = arith.addf %19, %21 : vector<4x256xf32>
    %c0_17 = arith.constant 0 : index
    %c0_18 = arith.constant 0 : index
    %c0_19 = arith.constant 0 : index
    %23 = vector.load %arg7[%c0_17, %c0_18, %c0_19] : memref<1x4x256xf32, #tpu.memory_space<vmem>>, vector<1x4x256xf32>
    %24 = vector.shape_cast %23 : vector<1x4x256xf32> to vector<4x256xf32>
    %25 = vector.shape_cast %22 : vector<4x256xf32> to vector<1x4x256xf32>
    tpu.vector_store %arg7[%c0_17, %c0_18, %c0_19], %25 {strides = array<i32>} : memref<1x4x256xf32, #tpu.memory_space<vmem>>, vector<1x4x256xf32>,
    return
  }
  func.func @transform_0(%arg0: i32, %arg1: i32) -> (i32, i32, i32) {
    %c0_i32 = arith.constant 0 : i32
    %c0_i32_0 = arith.constant 0 : i32
    return %arg0, %c0_i32, %arg1 : i32, i32, i32
  }
  func.func @transform_1(%arg0: i32, %arg1: i32) -> (i32, i32, i32) {
    %c0_i32 = arith.constant 0 : i32
    %c0_i32_0 = arith.constant 0 : i32
    %c0_i32_1 = arith.constant 0 : i32
    %c0_i32_2 = arith.constant 0 : i32
    return %c0_i32, %c0_i32_0, %c0_i32_1 : i32, i32, i32
  }
  func.func @transform_2(%arg0: i32, %arg1: i32) -> (i32, i32, i32) {
    %c0_i32 = arith.constant 0 : i32
    %c0_i32_0 = arith.constant 0 : i32
    %c0_i32_1 = arith.constant 0 : i32
    %c0_i32_2 = arith.constant 0 : i32
    return %c0_i32, %c0_i32_0, %c0_i32_1 : i32, i32, i32
  }
  func.func @transform_3(%arg0: i32, %arg1: i32) -> (i32, i32, i32) {
    %c0_i32 = arith.constant 0 : i32
    %c0_i32_0 = arith.constant 0 : i32
    %c0_i32_1 = arith.constant 0 : i32
    %c0_i32_2 = arith.constant 0 : i32
    return %c0_i32, %c0_i32_0, %c0_i32_1 : i32, i32, i32
  }
  func.func @transform_4(%arg0: i32, %arg1: i32) -> (i32, i32) {
    %c0_i32 = arith.constant 0 : i32
    %c0_i32_0 = arith.constant 0 : i32
    %c0_i32_1 = arith.constant 0 : i32
    return %c0_i32, %c0_i32_0 : i32, i32
  }
  func.func @transform_5(%arg0: i32, %arg1: i32) -> (i32, i32, i32) {
    %c0_i32 = arith.constant 0 : i32
    %c0_i32_0 = arith.constant 0 : i32
    return %arg0, %c0_i32, %arg1 : i32, i32, i32
  }
}

</mosaic_0001>

<bundles_post_ra>
// kernel: mlp_forward.1
= control target key start
LH: loop header
LB: loop body
LE: loop exit
PB: predicated region body
PF: predicated region fallthrough
CT: control target
= control target key end

     0   :  { %s745_s18 = smov 0   ;;  %s747_s19 = smov 0   ;;  %s815_s0 = inlined_call_operand.vmem [shape: f32[2,4,256], index: 0, kind: input, shape index: {}]   ;;  %s816_s1 = inlined_call_operand.vmem [shape: f32[1,32,4], index: 1, kind: input, shape index: {}]   ;;  %s817_s2 = inlined_call_operand.vmem [shape: f32[1,32,1], index: 2, kind: input, shape index: {}]   ;;  %s818_s3 = inlined_call_operand.vmem [shape: f32[1,4,32], index: 3, kind: input, shape index: {}]   ;;  %s819_s4 = inlined_call_operand.vmem [shape: f32[4,1], index: 4, kind: input, shape index: {}]   ;;  %s820_s5 = inlined_call_operand.vmem [shape: f32[2,4,256], index: 5, kind: output, shape index: {}]  }
   0x1   :  { %s749_s20 = smov 0  }
   0x2 LB: > { %s27_s21 = sadd.s32 1, %s707_s19  ;;  %p620_p0 = scmp.ge.s32.totalorder %s711_s20, 1  ;;  %s711_s20 = sphi %s749_s20, %s15_s20   ;;  %s707_s19 = sphi %s747_s19, %s822_s19   ;;  %s703_s18 = sphi %s745_s18, %s821_s18  }
   0x3   : > { %p29_p1 = scmp.ge.s32.totalorder %s27_s21, 2  ;;  %p208_p2 = scmp.lt.s32.totalorder %s711_s20, 3 }
   0x5   : > { %s824_s21 = smov (%p29_p1, %s27_s21), 0  ;;  %p209_p3 = pnand %p620_p0, %p208_p2 }
   0x6   : > { %p245_p4 = scmp.lt.s32.totalorder (!%p209_p3), %s703_s18, 1  ;;  %v713_v0 = vmov (!%p209_p3), 0.0   ;;  %v269_v1 = vld [vmem:[%s817_s2] sm:$0xff] (!%p209_p3)  ;;  %v714_v2 = vmov (!%p209_p3), 0   ;;  %v271_v3 = vld [vmem:[%s817_s2 + $0x10] sm:$0xff] (!%p209_p3)  ;;  %v270_v4 = vld [vmem:[%s817_s2 + $0x8] sm:$0xff] (!%p209_p3) }
   0x7   : > { %212 = sbr.rel (%p209_p3) target bundleno = 490 (0x1ea), region = 40  ;;  %377 = vmatprep.mubr.f32.mxu0 (!%p209_p3), %v713_v0  ;;  %517 = vmatprep.mubr.f32.mxu1 (!%p209_p3), %v713_v0  ;;  %v272_v5 = vld [vmem:[%s817_s2 + $0x18] sm:$0xff] (!%p209_p3)  ;;  %vm308_vm0 = vcmask (!%p209_p3), 1043456   ;;  %v265_v8 = vld [vmem:[%s816_s1] sm:$0xff] (!%p209_p3)  ;;  %vm295_vm1 = vcmask (!%p209_p3), 31744   ;;  %v266_v10 = vld [vmem:[%s816_s1 + $0x8] sm:$0xff] (!%p209_p3) }
   0x8   : > { %670 = vset.pattern.permute.xlu0 (!%p209_p3), %v714_v2  ;;  %671 = vset.pattern.permute.xlu1 (!%p209_p3), %v714_v2  ;;  %v443_v9 = vld [vmem:[%s819_s4] sm:$0xf] (!%p209_p3)  ;;  %v267_v11 = vld [vmem:[%s816_s1 + $0x10] sm:$0xff] (!%p209_p3)  ;;  %v268_v12 = vld [vmem:[%s816_s1 + $0x18] sm:$0xff] (!%p209_p3)  ;;  %vm449_vm2 = vcmask (!%p209_p3), 261120  }
   0x9   : > { %275 = vperm.xlu0 (!%p209_p3), %670, %v269_v1   ;;  %285 = vperm.xlu1 (!%p209_p3), %671, %v271_v3  }
   0xd   : > { %280 = vperm.xlu0 (!%p209_p3), %670, %v270_v4   ;;  %290 = vperm.xlu1 (!%p209_p3), %671, %v272_v5  }
   0xe   : > { %s826_s18 = smov (!%p245_p4, %s703_s18), 1 }
   0xf   : > { %s634_s26 = sshll.u32 %s826_s18, 3 }
  0x10   : > { %s252_s8 = scalar_lea.vmem %s815_s0, %s634_s26  ;;  %s262_s28 = scalar_lea.vmem %s820_s5, %s634_s26 }
  0x11   : > { %v264_v6 = vld [vmem:[%s252_s8] sm:$0xff]  ;;  %446 = vperm.xlu0 %670, %v443_v9  }
  0x12   : > { %v294_v7 = vcombine.high %v264_v6, %v264_v6 }
  0x14   : > { %625 = vmatprep.subr.msk.mxu0 %vm308_vm0, %v294_v7 }
  0x15   : > { %626 = vmatpush1.msk.msra.mxu0 %vm308_vm0, %v264_v6 }
  0x16   : > { %627 = vmatmul.mubr.msk.f32.vlgmr.msra.gmra.mrb[0].mxu0 %vm295_vm1, %v265_v8 }
  0x17   : > { %383 = vmatprep.mubr.f32.mxu0 %v713_v0 }
  0x1a   : > { %628 = vmatmul.mubr.msk.f32.gmra.mrb[2].mxu0 %vm295_vm1, %v266_v10 }
  0x1b   : > { %389 = vmatprep.mubr.f32.mxu0 %v713_v0 }
  0x1e   : > { %629 = vmatmul.mubr.msk.f32.gmra.mrb[4].mxu0 %vm295_vm1, %v267_v11 }
  0x1f   : > { %395 = vmatprep.mubr.f32.mxu0 %v713_v0 }
  0x22   : > { %630 = vmatmul.mubr.msk.f32.gmra.mrb[6].mxu0 %vm295_vm1, %v268_v12 }
  0x88   : > { %v276_v13 = vpop.permute.xlu0 %275  ;;  %v286_v24 = vpop.permute.xlu1 %285 }
  0x8c   : > { %v281_v19 = vpop.permute.xlu0 %280  ;;  %v291_v33 = vpop.permute.xlu1 %290 }
  0xe9   : > { %v379_v14 = vpop.f32.mrb[0].mxu0 }
  0xea   : > { %v380_v15 = vadd.f32 %v379_v14, %v276_v13  ;;  %v381_v16 = vpop.f32.mrb[1].mxu0  ;;  %v447_v14 = vpop.permute.xlu0 %446 }
  0xeb   : > { %v382_v17 = vadd.f32 %v381_v16, %v276_v13  ;;  %v442_v13 = vld [vmem:[%s818_s3] sm:$0xf] }
  0xec   : > { %v410_v18 = vmul.f32 0.70710677, %v380_v15  ;;  %v402_v47 = vmul.f32 0.5, %v380_v15 }
  0xed   : > { %v411_v20 = vmul.f32 0.70710677, %v382_v17  ;;  %v385_v21 = vpop.f32.mrb[2].mxu0  ;;  %v403_v50 = vmul.f32 0.5, %v382_v17 }
  0xee   : > { %673 = verf.f32 %v410_v18  ;;  %v386_v22 = vadd.f32 %v385_v21, %v281_v19  ;;  %v387_v23 = vpop.f32.mrb[3].mxu0 }
  0xef   : > { %675 = verf.f32 %v411_v20  ;;  %v388_v25 = vadd.f32 %v387_v23, %v281_v19 }
  0xf0   : > { %v412_v26 = vmul.f32 0.70710677, %v386_v22  ;;  %v404_v48 = vmul.f32 0.5, %v386_v22 }
  0xf1   : > { %v413_v27 = vmul.f32 0.70710677, %v388_v25  ;;  %v391_v28 = vpop.f32.mrb[4].mxu0  ;;  %v405_v51 = vmul.f32 0.5, %v388_v25 }
  0xf2   : > { %677 = verf.f32 %v412_v26  ;;  %v392_v29 = vadd.f32 %v391_v28, %v286_v24  ;;  %v393_v30 = vpop.f32.mrb[5].mxu0 }
  0xf3   : > { %679 = verf.f32 %v413_v27  ;;  %v394_v31 = vadd.f32 %v393_v30, %v286_v24 }
  0xf4   : > { %v414_v32 = vmul.f32 0.70710677, %v392_v29  ;;  %v406_v1 = vmul.f32 0.5, %v392_v29 }
  0xf5   : > { %v415_v34 = vmul.f32 0.70710677, %v394_v31  ;;  %v397_v35 = vpop.f32.mrb[6].mxu0  ;;  %v407_v4 = vmul.f32 0.5, %v394_v31 }
  0xf6   : > { %681 = verf.f32 %v414_v32  ;;  %v398_v36 = vadd.f32 %v397_v35, %v291_v33  ;;  %v399_v37 = vpop.f32.mrb[7].mxu0 }
  0xf7   : > { %683 = verf.f32 %v415_v34  ;;  %v400_v38 = vadd.f32 %v399_v37, %v291_v33 }
  0xf8   : > { %v674_v39 = vpop.eup %673  ;;  %v416_v40 = vmul.f32 0.70710677, %v398_v36  ;;  %v408_v2 = vmul.f32 0.5, %v398_v36 }
  0xf9   : > { %v676_v41 = vpop.eup %675  ;;  %v417_v42 = vmul.f32 0.70710677, %v400_v38  ;;  %v426_v43 = vadd.f32 1.0, %v674_v39  ;;  %v409_v5 = vmul.f32 0.5, %v400_v38 }
  0xfa   : > { %685 = verf.f32 %v416_v40  ;;  %v427_v45 = vadd.f32 1.0, %v676_v41 }
  0xfb   : > { %687 = verf.f32 %v417_v42  ;;  %v434_v53 = vmul.f32 %v426_v43, %v402_v47 }
  0xfc   : > { %v678_v44 = vpop.eup %677  ;;  %v435_v56 = vmul.f32 %v427_v45, %v403_v50 }
  0xfd   : > { %v680_v46 = vpop.eup %679  ;;  %v428_v49 = vadd.f32 1.0, %v678_v44 }
  0xfe   : > { %v429_v52 = vadd.f32 1.0, %v680_v46 }
  0xff   : > { %v436_v54 = vmul.f32 %v428_v49, %v404_v48 }
 0x100   : > { %v682_v55 = vpop.eup %681  ;;  %v437_v57 = vmul.f32 %v429_v52, %v405_v51 }
 0x101   : > { %v684_v58 = vpop.eup %683  ;;  %v638_v59 = vpack.c.bf16 %v436_v54, %v434_v53  ;;  %v430_v61 = vadd.f32 1.0, %v682_v55 }
 0x102   : > { %v636_v60 = vpack.c.bf16 %v437_v57, %v435_v56  ;;  %v431_v63 = vadd.f32 1.0, %v684_v58 }
 0x103   : > { %v438_v7 = vmul.f32 %v430_v61, %v406_v1 }
 0x104   : > { %v686_v62 = vpop.eup %685  ;;  %637 = vmatprep.subr.bf16.mxu1 %v636_v60  ;;  %v439_v9 = vmul.f32 %v431_v63, %v407_v4 }
 0x105   : > { %v688_v0 = vpop.eup %687  ;;  %v432_v3 = vadd.f32 1.0, %v686_v62  ;;  %639 = vmatpush1.bf16.msra.mxu1 %v638_v59 }
 0x106   : > { %v433_v6 = vadd.f32 1.0, %v688_v0 }
 0x107   : > { %v440_v8 = vmul.f32 %v432_v3, %v408_v2 }
 0x108   : > { %v441_v10 = vmul.f32 %v433_v6, %v409_v5 }
 0x109   : > { %v642_v11 = vpack.c.bf16 %v440_v8, %v438_v7 }
 0x10a   : > { %v640_v12 = vpack.c.bf16 %v441_v10, %v439_v9 }
 0x10c   : > { %641 = vmatprep.subr.bf16.mxu1 %v640_v12 }
 0x10d   : > { %643 = vmatpush1.bf16.msra.mxu1 %v642_v11 }
 0x110   : > { %631 = vmatmul.mubr.msk.f32.vlgmr.msra.gmra.mrb[0].mxu1 %vm449_vm2, %v442_v13 }
 0x1e3   : > { %v519_v15 = vpop.f32.mrb[0].mxu1 }
 0x1e4   : > { %v520_v16 = vadd.f32 %v519_v15, %v447_v14  ;;  %v521_v17 = vpop.f32.mrb[1].mxu1 }
 0x1e5   : > { %v522_v18 = vadd.f32 %v521_v17, %v447_v14 }
 0x1e7   : > { %v526_v19 = vcombine.low %v520_v16, %v522_v18 }
 0x1e9   : > { %528 = vst [vmem:[%s262_s28] sm:$0xff] %v526_v19 }
 0x1ea PF: > { %s15_s20 = sadd.s32 1, %s711_s20   ;;  %s821_s18 = smov %s707_s19 }
 0x1eb   : > { %p12_p5 = scmp.ge.s32.totalorder %s15_s20, 4   ;;  %s822_s19 = smov %s824_s21 }
 0x1ed   :  { %14 = sbr.rel (!%p12_p5) target bundleno = 2 (0x2), region = 70 }

</bundles_post_ra>
